<compile_context>
chip_gen: v7x
topology: tpu7x:2x2x1
jax: 0.10.0
libtpu: 0.0.40
codegen_flags: <defaults>
</compile_context>

<pallas_src>
import functools
import math

import jax
import jax.numpy as jnp
from jax import lax
from jax.experimental import pallas as pl
from jax.experimental.pallas import tpu as pltpu


def _bert_attention_kernel(x_ref, mask_ref, wqkv_ref, bqkv_ref, wo_ref, bo_ref,
                           gamma_ref, beta_ref, o_ref, q_s, k_s, v_s,
                           *, num_heads, head_dim, tq, ln_eps):
    # x_ref:   [1, S, H]  full sequence for the current batch element (revisited across qt)
    # mask_ref:[1, 1, S]  additive key mask
    # wqkv_ref:[H, 3H] bf16 (fused Wq|Wk|Wv, already transposed to [in, out])
    # wo_ref:  [NH, d, H] bf16 (Wo^T split per head) ; biases / LN params f32 [1, *]
    # q_s/k_s/v_s: VMEM scratch [NH, S, d] bf16, persistent across the query-tile axis.
    H = num_heads * head_dim
    qt = pl.program_id(1)

    # ---- Once per batch element: fused QKV projection, cached per-head in VMEM ----------
    @pl.when(qt == 0)
    def _build_qkv():
        x_full = x_ref[0].astype(jnp.bfloat16)                                    # [S, H]
        qkv = jnp.dot(x_full, wqkv_ref[...],
                      preferred_element_type=jnp.float32) + bqkv_ref[...]         # [S, 3H] f32
        scale = 1.0 / math.sqrt(head_dim)
        for h in range(num_heads):                      # static scatter, once per batch elem
            lo = h * head_dim
            q_s[h] = (qkv[:, lo:lo + head_dim] * scale).astype(jnp.bfloat16)
            k_s[h] = qkv[:, H + lo:H + lo + head_dim].astype(jnp.bfloat16)
            v_s[h] = qkv[:, 2 * H + lo:2 * H + lo + head_dim].astype(jnp.bfloat16)

    # ---- Per query tile: attention over all keys, fused with the output projection ------
    qoff = pl.multiple_of(qt * tq, tq)
    mask = mask_ref[0].astype(jnp.float32)                  # [1, S], broadcast over queries
    dn = (((1,), (1,)), ((), ()))                           # contract last dims (q @ k^T)

    def head_body(h, acc):
        qh = q_s[h, pl.ds(qoff, tq), :]                     # [TQ, d] bf16 (pre-scaled)
        kh = k_s[h]                                         # [S,  d] bf16
        vh = v_s[h]                                         # [S,  d] bf16
        s = lax.dot_general(qh, kh, dn, preferred_element_type=jnp.float32)   # [TQ, S] f32
        s = s + mask
        m = jnp.max(s, axis=-1, keepdims=True)
        p = jnp.exp(s - m)
        denom = jnp.sum(p, axis=-1, keepdims=True)
        p = p * pl.reciprocal(denom, approx=True)           # softmax via EUP reciprocal
        ctx = jnp.dot(p.astype(jnp.bfloat16), vh,
                      preferred_element_type=jnp.float32)   # [TQ, d]
        # Accumulate this head's contribution of the output dense (lane-dense [TQ, H]).
        return acc + jnp.dot(ctx.astype(jnp.bfloat16), wo_ref[h],
                             preferred_element_type=jnp.float32)

    attn = lax.fori_loop(0, num_heads, head_body, jnp.zeros((tq, H), jnp.float32))
    attn = attn + bo_ref[...]

    # ---- Residual + LayerNorm (kept in f32) ---------------------------------------------
    x_tile = x_ref[0, pl.ds(qoff, tq), :].astype(jnp.float32)                   # [TQ, H]
    y = attn + x_tile
    mu = jnp.mean(y, axis=-1, keepdims=True)
    yc = y - mu
    var = jnp.mean(yc * yc, axis=-1, keepdims=True)
    o_ref[0] = (yc * lax.rsqrt(var + ln_eps) * gamma_ref[...]
                + beta_ref[...]).astype(o_ref.dtype)


def bert_attention(hidden_states, params, *, num_heads, ln_eps=1e-12,
                   attention_mask=None, q_tile=256):
    """hidden_states: [B, S, H]; params = (wq,bq,wk,bk,wv,bv,wo,bo,gamma,beta) in PyTorch
    layouts (weights [out, in], vectors [H]); attention_mask: optional additive [B, S]."""
    B, S, H = hidden_states.shape
    assert H % num_heads == 0
    d = H // num_heads
    wq, bq, wk, bk, wv, bv, wo, bo, gamma, beta = params

    # Fused QKV weight, transposed to [in, out] and cast to bf16 for the MXU.
    w_qkv = jnp.concatenate([wq, wk, wv], axis=0).T.astype(jnp.bfloat16)        # [H, 3H]
    b_qkv = jnp.concatenate([bq, bk, bv]).reshape(1, 3 * H).astype(jnp.float32)
    # Output projection pre-split per head: Wo^T reshaped to [NH, d, H], bf16.
    wo_heads = wo.T.reshape(num_heads, d, H).astype(jnp.bfloat16)
    bo_r = bo.reshape(1, H).astype(jnp.float32)
    gamma_r = gamma.reshape(1, H).astype(jnp.float32)
    beta_r = beta.reshape(1, H).astype(jnp.float32)

    if attention_mask is None:
        attention_mask = jnp.zeros((B, S), jnp.float32)
    mask3d = attention_mask.astype(jnp.float32).reshape(B, 1, S)

    # Query-tile size: TQ | S (TQ == S for short sequences).
    tq = q_tile if (q_tile is not None and S > q_tile and S % q_tile == 0) else S
    n_qt = S // tq

    # Explicit VMEM budget from the real footprint (weights + streamed blocks + scratch).
    # TODO(synk): single-buffer the constant-index weight specs (pl.Buffered(1)) once verified.
    in_bytes = hidden_states.dtype.itemsize
    est = (2 * S * H * in_bytes                              # hidden block (double-buffered)
           + 2 * S * 4                                       # mask block
           + 2 * (3 * H * H + H * H) * 2                     # fused QKV + Wo weights (bf16)
           + 2 * 6 * H * 4                                   # biases + LN params
           + 2 * tq * H * in_bytes                           # output block
           + 3 * num_heads * S * max(d, 128) * 2             # q/k/v scratch (lane-padded)
           + S * 3 * H * 4                                   # qkv f32 intermediate (qt==0)
           + 4 * tq * max(S, 128) * 4)                       # score/prob intermediates
    vmem_limit = int(min(96 * 2 ** 20, max(32 * 2 ** 20, int(1.5 * est))))

    kern = functools.partial(_bert_attention_kernel, num_heads=num_heads,
                             head_dim=d, tq=tq, ln_eps=ln_eps)

    return pl.pallas_call(
        kern,
        out_shape=jax.ShapeDtypeStruct((B, S, H), hidden_states.dtype),
        grid=(B, n_qt),
        in_specs=[
            pl.BlockSpec((1, S, H), lambda b, q: (b, 0, 0)),         # hidden (full seq / batch)
            pl.BlockSpec((1, 1, S), lambda b, q: (b, 0, 0)),         # additive key mask
            pl.BlockSpec((H, 3 * H), lambda b, q: (0, 0)),           # fused Wqkv (resident)
            pl.BlockSpec((1, 3 * H), lambda b, q: (0, 0)),           # fused bias qkv
            pl.BlockSpec((num_heads, d, H), lambda b, q: (0, 0, 0)), # per-head Wo (resident)
            pl.BlockSpec((1, H), lambda b, q: (0, 0)),               # bo
            pl.BlockSpec((1, H), lambda b, q: (0, 0)),               # LN gamma
            pl.BlockSpec((1, H), lambda b, q: (0, 0)),               # LN beta
        ],
        out_specs=pl.BlockSpec((1, tq, H), lambda b, q: (b, q, 0)),
        scratch_shapes=[pltpu.VMEM((num_heads, S, d), jnp.bfloat16)] * 3,  # q / k / v cache
        compiler_params=pltpu.CompilerParams(
            dimension_semantics=("parallel", "arbitrary"),
            vmem_limit_bytes=vmem_limit),
    )(hidden_states, mask3d, w_qkv, b_qkv, wo_heads, bo_r, gamma_r, beta_r)


if __name__ == "__main__":
    B, S, H, NH = 2, 8, 32, 4
    EPS = 1e-12

    key = jax.random.PRNGKey(0)
    keys = jax.random.split(key, 12)
    bound = 1.0 / math.sqrt(H)

    def lin(kw, kb):
        w = jax.random.uniform(kw, (H, H), jnp.float32, -bound, bound)   # [out, in]
        b = jax.random.uniform(kb, (H,), jnp.float32, -bound, bound)
        return w, b

    wq, bq = lin(keys[0], keys[1])
    wk, bk = lin(keys[2], keys[3])
    wv, bv = lin(keys[4], keys[5])
    wo, bo = lin(keys[6], keys[7])
    gamma = 1.0 + 0.1 * jax.random.normal(keys[8], (H,), jnp.float32)
    beta = 0.1 * jax.random.normal(keys[9], (H,), jnp.float32)

    x = jax.random.normal(keys[10], (B, S, H), jnp.float32)
    # Additive attention mask: mask out the last two key positions of batch 1.
    attn_mask = jnp.zeros((B, S), jnp.float32).at[1, -2:].set(-1e4)

    params = (wq, bq, wk, bk, wv, bv, wo, bo, gamma, beta)
    out = bert_attention(x, params, num_heads=NH, ln_eps=EPS, attention_mask=attn_mask)
    out = jax.block_until_ready(out)

    # Pure-JAX f32 reference (mirrors the PyTorch forward in eval mode).
    def ref(x, mask):
        dd = H // NH
        q = x @ wq.T + bq
        k = x @ wk.T + bk
        v = x @ wv.T + bv
        split = lambda t: t.reshape(B, S, NH, dd).transpose(0, 2, 1, 3)
        qh, kh, vh = split(q), split(k), split(v)
        sc = jnp.einsum('bhqd,bhkd->bhqk', qh, kh) / math.sqrt(dd)
        sc = sc + mask[:, None, None, :]
        p = jax.nn.softmax(sc, axis=-1)
        ctx = jnp.einsum('bhqk,bhkd->bhqd', p, vh).transpose(0, 2, 1, 3).reshape(B, S, H)
        a = ctx @ wo.T + bo
        y = a + x
        mu = y.mean(-1, keepdims=True)
        var = ((y - mu) ** 2).mean(-1, keepdims=True)
        return (y - mu) / jnp.sqrt(var + EPS) * gamma + beta

    r = ref(x, attn_mask)
    err = float(jnp.max(jnp.abs(out - r)))
    assert out.shape == (B, S, H)
    # bf16 MXU operands + approx reciprocal -> compare against f32 ref with a loose tolerance.
    assert jnp.allclose(out, r, atol=3e-2, rtol=3e-2), err
    print("KERNEL_OK")
</pallas_src>

<mosaic_0001>
module attributes {stable_mosaic.version = 11 : i64} {
  func.func @_bert_attention_kernel(%arg0: i32, %arg1: i32, %arg2: memref<1x8x32xf32, #tpu.memory_space<vmem>>, %arg3: memref<1x1x8xf32, #tpu.memory_space<vmem>>, %arg4: memref<32x96xbf16, #tpu.memory_space<vmem>>, %arg5: memref<1x96xf32, #tpu.memory_space<vmem>>, %arg6: memref<4x8x32xbf16, #tpu.memory_space<vmem>>, %arg7: memref<1x32xf32, #tpu.memory_space<vmem>>, %arg8: memref<1x32xf32, #tpu.memory_space<vmem>>, %arg9: memref<1x32xf32, #tpu.memory_space<vmem>>, %arg10: memref<1x8x32xf32, #tpu.memory_space<vmem>>, %arg11: memref<4x8x8xbf16, #tpu.memory_space<vmem>>, %arg12: memref<4x8x8xbf16, #tpu.memory_space<vmem>>, %arg13: memref<4x8x8xbf16, #tpu.memory_space<vmem>>) attributes {dimension_semantics = [#tpu.dimension_semantics<parallel>, #tpu.dimension_semantics<arbitrary>], iteration_bounds = array<i64: 2, 1>, scalar_prefetch = 0 : i64, scratch_operands = 3 : i64, tpu.core_type = #tpu.core_type<tc>, window_params = [{transform_indices = @transform_0, window_bounds = array<i64: 1, 8, 32>}, {transform_indices = @transform_1, window_bounds = array<i64: 1, 1, 8>}, {pipeline_mode = #tpu.pipeline_mode<synchronous>, transform_indices = @transform_2, window_bounds = array<i64: 32, 96>}, {pipeline_mode = #tpu.pipeline_mode<synchronous>, transform_indices = @transform_3, window_bounds = array<i64: 1, 96>}, {pipeline_mode = #tpu.pipeline_mode<synchronous>, transform_indices = @transform_4, window_bounds = array<i64: 4, 8, 32>}, {pipeline_mode = #tpu.pipeline_mode<synchronous>, transform_indices = @transform_5, window_bounds = array<i64: 1, 32>}, {pipeline_mode = #tpu.pipeline_mode<synchronous>, transform_indices = @transform_6, window_bounds = array<i64: 1, 32>}, {pipeline_mode = #tpu.pipeline_mode<synchronous>, transform_indices = @transform_7, window_bounds = array<i64: 1, 32>}, {transform_indices = @transform_8, window_bounds = array<i64: 1, 8, 32>}]} {
    %c0_i32 = arith.constant 0 : i32
    %0 = arith.cmpi eq, %arg1, %c0_i32 : i32
    %1 = arith.extui %0 : i1 to i32
    %c0_i32_0 = arith.constant 0 : i32
    %2 = arith.cmpi ne, %1, %c0_i32_0 : i32
    scf.if %2 {
      %c0_21 = arith.constant 0 : index
      %c0_22 = arith.constant 0 : index
      %c0_23 = arith.constant 0 : index
      %42 = vector.load %arg2[%c0_21, %c0_22, %c0_23] : memref<1x8x32xf32, #tpu.memory_space<vmem>>, vector<1x8x32xf32>
      %43 = vector.shape_cast %42 : vector<1x8x32xf32> to vector<8x32xf32>
      %44 = arith.truncf %43 : vector<8x32xf32> to vector<8x32xbf16>
      %c0_24 = arith.constant 0 : index
      %c0_25 = arith.constant 0 : index
      %45 = vector.load %arg4[%c0_24, %c0_25] : memref<32x96xbf16, #tpu.memory_space<vmem>>, vector<32x96xbf16>
      %cst_26 = arith.constant dense<0.000000e+00> : vector<8x96xf32>
      %46 = tpu.matmul %44, %45, %cst_26 {dimension_numbers = #tpu.dot_dimension_numbers<[1], [0], [0], [1], [0, 0, 1, 1], [], []>} : vector<8x32xbf16>, vector<32x96xbf16>, vector<8x96xf32> -> vector<8x96xf32>
      %c0_27 = arith.constant 0 : index
      %c0_28 = arith.constant 0 : index
      %47 = vector.load %arg5[%c0_27, %c0_28] : memref<1x96xf32, #tpu.memory_space<vmem>>, vector<1x96xf32>
      %48 = vector.broadcast %47 : vector<1x96xf32> to vector<8x96xf32>
      %49 = arith.addf %46, %48 : vector<8x96xf32>
      %50 = vector.extract_strided_slice %49 {offsets = [0, 0], sizes = [8, 8], strides = [1, 1]} : vector<8x96xf32> to vector<8x8xf32>
      %cst_29 = arith.constant 0.353553385 : f32
      %51 = vector.broadcast %cst_29 : f32 to vector<8x8xf32>
      %52 = arith.mulf %50, %51 : vector<8x8xf32>
      %53 = arith.truncf %52 : vector<8x8xf32> to vector<8x8xbf16>
      %c0_30 = arith.constant 0 : index
      %c0_31 = arith.constant 0 : index
      %c0_32 = arith.constant 0 : index
      %54 = vector.load %arg11[%c0_30, %c0_31, %c0_32] : memref<4x8x8xbf16, #tpu.memory_space<vmem>>, vector<1x8x8xbf16>
      %55 = vector.shape_cast %54 : vector<1x8x8xbf16> to vector<8x8xbf16>
      %56 = vector.shape_cast %53 : vector<8x8xbf16> to vector<1x8x8xbf16>
      tpu.vector_store %arg11[%c0_30, %c0_31, %c0_32], %56 {strides = array<i32>} : memref<4x8x8xbf16, #tpu.memory_space<vmem>>, vector<1x8x8xbf16>,
      %57 = vector.extract_strided_slice %49 {offsets = [0, 32], sizes = [8, 8], strides = [1, 1]} : vector<8x96xf32> to vector<8x8xf32>
      %58 = arith.truncf %57 : vector<8x8xf32> to vector<8x8xbf16>
      %c0_33 = arith.constant 0 : index
      %c0_34 = arith.constant 0 : index
      %c0_35 = arith.constant 0 : index
      %59 = vector.load %arg12[%c0_33, %c0_34, %c0_35] : memref<4x8x8xbf16, #tpu.memory_space<vmem>>, vector<1x8x8xbf16>
      %60 = vector.shape_cast %59 : vector<1x8x8xbf16> to vector<8x8xbf16>
      %61 = vector.shape_cast %58 : vector<8x8xbf16> to vector<1x8x8xbf16>
      tpu.vector_store %arg12[%c0_33, %c0_34, %c0_35], %61 {strides = array<i32>} : memref<4x8x8xbf16, #tpu.memory_space<vmem>>, vector<1x8x8xbf16>,
      %62 = vector.extract_strided_slice %49 {offsets = [0, 64], sizes = [8, 8], strides = [1, 1]} : vector<8x96xf32> to vector<8x8xf32>
      %63 = arith.truncf %62 : vector<8x8xf32> to vector<8x8xbf16>
      %c0_36 = arith.constant 0 : index
      %c0_37 = arith.constant 0 : index
      %c0_38 = arith.constant 0 : index
      %64 = vector.load %arg13[%c0_36, %c0_37, %c0_38] : memref<4x8x8xbf16, #tpu.memory_space<vmem>>, vector<1x8x8xbf16>
      %65 = vector.shape_cast %64 : vector<1x8x8xbf16> to vector<8x8xbf16>
      %66 = vector.shape_cast %63 : vector<8x8xbf16> to vector<1x8x8xbf16>
      tpu.vector_store %arg13[%c0_36, %c0_37, %c0_38], %66 {strides = array<i32>} : memref<4x8x8xbf16, #tpu.memory_space<vmem>>, vector<1x8x8xbf16>,
      %67 = vector.extract_strided_slice %49 {offsets = [0, 8], sizes = [8, 8], strides = [1, 1]} : vector<8x96xf32> to vector<8x8xf32>
      %cst_39 = arith.constant 0.353553385 : f32
      %68 = vector.broadcast %cst_39 : f32 to vector<8x8xf32>
      %69 = arith.mulf %67, %68 : vector<8x8xf32>
      %70 = arith.truncf %69 : vector<8x8xf32> to vector<8x8xbf16>
      %c1 = arith.constant 1 : index
      %c0_40 = arith.constant 0 : index
      %c0_41 = arith.constant 0 : index
      %71 = vector.load %arg11[%c1, %c0_40, %c0_41] : memref<4x8x8xbf16, #tpu.memory_space<vmem>>, vector<1x8x8xbf16>
      %72 = vector.shape_cast %71 : vector<1x8x8xbf16> to vector<8x8xbf16>
      %73 = vector.shape_cast %70 : vector<8x8xbf16> to vector<1x8x8xbf16>
      tpu.vector_store %arg11[%c1, %c0_40, %c0_41], %73 {strides = array<i32>} : memref<4x8x8xbf16, #tpu.memory_space<vmem>>, vector<1x8x8xbf16>,
      %74 = vector.extract_strided_slice %49 {offsets = [0, 40], sizes = [8, 8], strides = [1, 1]} : vector<8x96xf32> to vector<8x8xf32>
      %75 = arith.truncf %74 : vector<8x8xf32> to vector<8x8xbf16>
      %c1_42 = arith.constant 1 : index
      %c0_43 = arith.constant 0 : index
      %c0_44 = arith.constant 0 : index
      %76 = vector.load %arg12[%c1_42, %c0_43, %c0_44] : memref<4x8x8xbf16, #tpu.memory_space<vmem>>, vector<1x8x8xbf16>
      %77 = vector.shape_cast %76 : vector<1x8x8xbf16> to vector<8x8xbf16>
      %78 = vector.shape_cast %75 : vector<8x8xbf16> to vector<1x8x8xbf16>
      tpu.vector_store %arg12[%c1_42, %c0_43, %c0_44], %78 {strides = array<i32>} : memref<4x8x8xbf16, #tpu.memory_space<vmem>>, vector<1x8x8xbf16>,
      %79 = vector.extract_strided_slice %49 {offsets = [0, 72], sizes = [8, 8], strides = [1, 1]} : vector<8x96xf32> to vector<8x8xf32>
      %80 = arith.truncf %79 : vector<8x8xf32> to vector<8x8xbf16>
      %c1_45 = arith.constant 1 : index
      %c0_46 = arith.constant 0 : index
      %c0_47 = arith.constant 0 : index
      %81 = vector.load %arg13[%c1_45, %c0_46, %c0_47] : memref<4x8x8xbf16, #tpu.memory_space<vmem>>, vector<1x8x8xbf16>
      %82 = vector.shape_cast %81 : vector<1x8x8xbf16> to vector<8x8xbf16>
      %83 = vector.shape_cast %80 : vector<8x8xbf16> to vector<1x8x8xbf16>
      tpu.vector_store %arg13[%c1_45, %c0_46, %c0_47], %83 {strides = array<i32>} : memref<4x8x8xbf16, #tpu.memory_space<vmem>>, vector<1x8x8xbf16>,
      %84 = vector.extract_strided_slice %49 {offsets = [0, 16], sizes = [8, 8], strides = [1, 1]} : vector<8x96xf32> to vector<8x8xf32>
      %cst_48 = arith.constant 0.353553385 : f32
      %85 = vector.broadcast %cst_48 : f32 to vector<8x8xf32>
      %86 = arith.mulf %84, %85 : vector<8x8xf32>
      %87 = arith.truncf %86 : vector<8x8xf32> to vector<8x8xbf16>
      %c2 = arith.constant 2 : index
      %c0_49 = arith.constant 0 : index
      %c0_50 = arith.constant 0 : index
      %88 = vector.load %arg11[%c2, %c0_49, %c0_50] : memref<4x8x8xbf16, #tpu.memory_space<vmem>>, vector<1x8x8xbf16>
      %89 = vector.shape_cast %88 : vector<1x8x8xbf16> to vector<8x8xbf16>
      %90 = vector.shape_cast %87 : vector<8x8xbf16> to vector<1x8x8xbf16>
      tpu.vector_store %arg11[%c2, %c0_49, %c0_50], %90 {strides = array<i32>} : memref<4x8x8xbf16, #tpu.memory_space<vmem>>, vector<1x8x8xbf16>,
      %91 = vector.extract_strided_slice %49 {offsets = [0, 48], sizes = [8, 8], strides = [1, 1]} : vector<8x96xf32> to vector<8x8xf32>
      %92 = arith.truncf %91 : vector<8x8xf32> to vector<8x8xbf16>
      %c2_51 = arith.constant 2 : index
      %c0_52 = arith.constant 0 : index
      %c0_53 = arith.constant 0 : index
      %93 = vector.load %arg12[%c2_51, %c0_52, %c0_53] : memref<4x8x8xbf16, #tpu.memory_space<vmem>>, vector<1x8x8xbf16>
      %94 = vector.shape_cast %93 : vector<1x8x8xbf16> to vector<8x8xbf16>
      %95 = vector.shape_cast %92 : vector<8x8xbf16> to vector<1x8x8xbf16>
      tpu.vector_store %arg12[%c2_51, %c0_52, %c0_53], %95 {strides = array<i32>} : memref<4x8x8xbf16, #tpu.memory_space<vmem>>, vector<1x8x8xbf16>,
      %96 = vector.extract_strided_slice %49 {offsets = [0, 80], sizes = [8, 8], strides = [1, 1]} : vector<8x96xf32> to vector<8x8xf32>
      %97 = arith.truncf %96 : vector<8x8xf32> to vector<8x8xbf16>
      %c2_54 = arith.constant 2 : index
      %c0_55 = arith.constant 0 : index
      %c0_56 = arith.constant 0 : index
      %98 = vector.load %arg13[%c2_54, %c0_55, %c0_56] : memref<4x8x8xbf16, #tpu.memory_space<vmem>>, vector<1x8x8xbf16>
      %99 = vector.shape_cast %98 : vector<1x8x8xbf16> to vector<8x8xbf16>
      %100 = vector.shape_cast %97 : vector<8x8xbf16> to vector<1x8x8xbf16>
      tpu.vector_store %arg13[%c2_54, %c0_55, %c0_56], %100 {strides = array<i32>} : memref<4x8x8xbf16, #tpu.memory_space<vmem>>, vector<1x8x8xbf16>,
      %101 = vector.extract_strided_slice %49 {offsets = [0, 24], sizes = [8, 8], strides = [1, 1]} : vector<8x96xf32> to vector<8x8xf32>
      %cst_57 = arith.constant 0.353553385 : f32
      %102 = vector.broadcast %cst_57 : f32 to vector<8x8xf32>
      %103 = arith.mulf %101, %102 : vector<8x8xf32>
      %104 = arith.truncf %103 : vector<8x8xf32> to vector<8x8xbf16>
      %c3 = arith.constant 3 : index
      %c0_58 = arith.constant 0 : index
      %c0_59 = arith.constant 0 : index
      %105 = vector.load %arg11[%c3, %c0_58, %c0_59] : memref<4x8x8xbf16, #tpu.memory_space<vmem>>, vector<1x8x8xbf16>
      %106 = vector.shape_cast %105 : vector<1x8x8xbf16> to vector<8x8xbf16>
      %107 = vector.shape_cast %104 : vector<8x8xbf16> to vector<1x8x8xbf16>
      tpu.vector_store %arg11[%c3, %c0_58, %c0_59], %107 {strides = array<i32>} : memref<4x8x8xbf16, #tpu.memory_space<vmem>>, vector<1x8x8xbf16>,
      %108 = vector.extract_strided_slice %49 {offsets = [0, 56], sizes = [8, 8], strides = [1, 1]} : vector<8x96xf32> to vector<8x8xf32>
      %109 = arith.truncf %108 : vector<8x8xf32> to vector<8x8xbf16>
      %c3_60 = arith.constant 3 : index
      %c0_61 = arith.constant 0 : index
      %c0_62 = arith.constant 0 : index
      %110 = vector.load %arg12[%c3_60, %c0_61, %c0_62] : memref<4x8x8xbf16, #tpu.memory_space<vmem>>, vector<1x8x8xbf16>
      %111 = vector.shape_cast %110 : vector<1x8x8xbf16> to vector<8x8xbf16>
      %112 = vector.shape_cast %109 : vector<8x8xbf16> to vector<1x8x8xbf16>
      tpu.vector_store %arg12[%c3_60, %c0_61, %c0_62], %112 {strides = array<i32>} : memref<4x8x8xbf16, #tpu.memory_space<vmem>>, vector<1x8x8xbf16>,
      %113 = vector.extract_strided_slice %49 {offsets = [0, 88], sizes = [8, 8], strides = [1, 1]} : vector<8x96xf32> to vector<8x8xf32>
      %114 = arith.truncf %113 : vector<8x8xf32> to vector<8x8xbf16>
      %c3_63 = arith.constant 3 : index
      %c0_64 = arith.constant 0 : index
      %c0_65 = arith.constant 0 : index
      %115 = vector.load %arg13[%c3_63, %c0_64, %c0_65] : memref<4x8x8xbf16, #tpu.memory_space<vmem>>, vector<1x8x8xbf16>
      %116 = vector.shape_cast %115 : vector<1x8x8xbf16> to vector<8x8xbf16>
      %117 = vector.shape_cast %114 : vector<8x8xbf16> to vector<1x8x8xbf16>
      tpu.vector_store %arg13[%c3_63, %c0_64, %c0_65], %117 {strides = array<i32>} : memref<4x8x8xbf16, #tpu.memory_space<vmem>>, vector<1x8x8xbf16>,
    } else {
    }
    %c8_i32 = arith.constant 8 : i32
    %3 = arith.muli %arg1, %c8_i32 : i32
    %4 = tpu.assume_multiple %3, 8 : i32
    %c0 = arith.constant 0 : index
    %c0_1 = arith.constant 0 : index
    %c0_2 = arith.constant 0 : index
    %5 = vector.load %arg3[%c0, %c0_1, %c0_2] : memref<1x1x8xf32, #tpu.memory_space<vmem>>, vector<1x1x8xf32>
    %6 = vector.shape_cast %5 : vector<1x1x8xf32> to vector<1x8xf32>
    %cst = arith.constant 0.000000e+00 : f32
    %7 = vector.broadcast %cst : f32 to vector<8x32xf32>
    %c0_i32_3 = arith.constant 0 : i32
    %c4_i32 = arith.constant 4 : i32
    %8 = arith.addi %c0_i32_3, %c4_i32 : i32
    %c1_i32 = arith.constant 1 : i32
    %9 = scf.for %arg14 = %c0_i32_3 to %8 step %c1_i32 iter_args(%arg15 = %7) -> (vector<8x32xf32>)  : i32 {
      %42 = arith.index_cast %arg14 : i32 to index
      %43 = arith.index_cast %4 : i32 to index
      %c0_21 = arith.constant 0 : index
      %44 = vector.load %arg11[%42, %43, %c0_21] : memref<4x8x8xbf16, #tpu.memory_space<vmem>>, vector<1x8x8xbf16>
      %45 = vector.shape_cast %44 : vector<1x8x8xbf16> to vector<8x8xbf16>
      %46 = arith.index_cast %arg14 : i32 to index
      %c0_22 = arith.constant 0 : index
      %c0_23 = arith.constant 0 : index
      %47 = vector.load %arg12[%46, %c0_22, %c0_23] : memref<4x8x8xbf16, #tpu.memory_space<vmem>>, vector<1x8x8xbf16>
      %48 = vector.shape_cast %47 : vector<1x8x8xbf16> to vector<8x8xbf16>
      %49 = arith.index_cast %arg14 : i32 to index
      %c0_24 = arith.constant 0 : index
      %c0_25 = arith.constant 0 : index
      %50 = vector.load %arg13[%49, %c0_24, %c0_25] : memref<4x8x8xbf16, #tpu.memory_space<vmem>>, vector<1x8x8xbf16>
      %51 = vector.shape_cast %50 : vector<1x8x8xbf16> to vector<8x8xbf16>
      %cst_26 = arith.constant dense<0.000000e+00> : vector<8x8xf32>
      %52 = tpu.matmul %45, %48, %cst_26 {dimension_numbers = #tpu.dot_dimension_numbers<[1], [1], [0], [0], [0, 0, 1, 0], [], []>} : vector<8x8xbf16>, vector<8x8xbf16>, vector<8x8xf32> -> vector<8x8xf32>
      %53 = vector.broadcast %6 : vector<1x8xf32> to vector<8x8xf32>
      %54 = arith.addf %52, %53 : vector<8x8xf32>
      %cst_27 = arith.constant dense<0xFF800000> : vector<8xf32>
      %55 = vector.multi_reduction <maximumf>, %54, %cst_27 [1] : vector<8x8xf32> to vector<8xf32>
      %56 = vector.shape_cast %55 : vector<8xf32> to vector<8x1xf32>
      %57 = vector.broadcast %56 : vector<8x1xf32> to vector<8x8xf32>
      %58 = arith.subf %54, %57 : vector<8x8xf32>
      %59 = math.exp %58 : vector<8x8xf32>
      %cst_28 = arith.constant dense<0.000000e+00> : vector<8xf32>
      %60 = vector.multi_reduction <add>, %59, %cst_28 [1] : vector<8x8xf32> to vector<8xf32>
      %61 = vector.shape_cast %60 : vector<8xf32> to vector<8x1xf32>
      %62 = tpu.reciprocal %61 {approx = true} : vector<8x1xf32> -> vector<8x1xf32>
      %63 = vector.broadcast %62 : vector<8x1xf32> to vector<8x8xf32>
      %64 = arith.mulf %59, %63 : vector<8x8xf32>
      %65 = arith.truncf %64 : vector<8x8xf32> to vector<8x8xbf16>
      %cst_29 = arith.constant dense<0.000000e+00> : vector<8x8xf32>
      %66 = tpu.matmul %65, %51, %cst_29 {dimension_numbers = #tpu.dot_dimension_numbers<[1], [0], [0], [1], [0, 0, 1, 1], [], []>} : vector<8x8xbf16>, vector<8x8xbf16>, vector<8x8xf32> -> vector<8x8xf32>
      %67 = arith.truncf %66 : vector<8x8xf32> to vector<8x8xbf16>
      %68 = arith.index_cast %arg14 : i32 to index
      %c0_30 = arith.constant 0 : index
      %c0_31 = arith.constant 0 : index
      %69 = vector.load %arg6[%68, %c0_30, %c0_31] : memref<4x8x32xbf16, #tpu.memory_space<vmem>>, vector<1x8x32xbf16>
      %70 = vector.shape_cast %69 : vector<1x8x32xbf16> to vector<8x32xbf16>
      %cst_32 = arith.constant dense<0.000000e+00> : vector<8x32xf32>
      %71 = tpu.matmul %67, %70, %cst_32 {dimension_numbers = #tpu.dot_dimension_numbers<[1], [0], [0], [1], [0, 0, 1, 1], [], []>} : vector<8x8xbf16>, vector<8x32xbf16>, vector<8x32xf32> -> vector<8x32xf32>
      %72 = arith.addf %arg15, %71 : vector<8x32xf32>
      scf.yield %72 : vector<8x32xf32>
    }
    %c4_i32_4 = arith.constant 4 : i32
    %c0_5 = arith.constant 0 : index
    %c0_6 = arith.constant 0 : index
    %10 = vector.load %arg7[%c0_5, %c0_6] : memref<1x32xf32, #tpu.memory_space<vmem>>, vector<1x32xf32>
    %11 = vector.broadcast %10 : vector<1x32xf32> to vector<8x32xf32>
    %12 = arith.addf %9, %11 : vector<8x32xf32>
    %c0_7 = arith.constant 0 : index
    %13 = arith.index_cast %4 : i32 to index
    %c0_8 = arith.constant 0 : index
    %14 = vector.load %arg2[%c0_7, %13, %c0_8] : memref<1x8x32xf32, #tpu.memory_space<vmem>>, vector<1x8x32xf32>
    %15 = vector.shape_cast %14 : vector<1x8x32xf32> to vector<8x32xf32>
    %16 = arith.addf %12, %15 : vector<8x32xf32>
    %cst_9 = arith.constant dense<0.000000e+00> : vector<8xf32>
    %17 = vector.multi_reduction <add>, %16, %cst_9 [1] : vector<8x32xf32> to vector<8xf32>
    %18 = vector.shape_cast %17 : vector<8xf32> to vector<8x1xf32>
    %cst_10 = arith.constant 3.200000e+01 : f32
    %19 = vector.broadcast %cst_10 : f32 to vector<8x1xf32>
    %20 = arith.divf %18, %19 : vector<8x1xf32>
    %21 = vector.broadcast %20 : vector<8x1xf32> to vector<8x32xf32>
    %22 = arith.subf %16, %21 : vector<8x32xf32>
    %23 = arith.mulf %22, %22 : vector<8x32xf32>
    %cst_11 = arith.constant dense<0.000000e+00> : vector<8xf32>
    %24 = vector.multi_reduction <add>, %23, %cst_11 [1] : vector<8x32xf32> to vector<8xf32>
    %25 = vector.shape_cast %24 : vector<8xf32> to vector<8x1xf32>
    %cst_12 = arith.constant 3.200000e+01 : f32
    %26 = vector.broadcast %cst_12 : f32 to vector<8x1xf32>
    %27 = arith.divf %25, %26 : vector<8x1xf32>
    %cst_13 = arith.constant 9.99999996E-13 : f32
    %28 = vector.broadcast %cst_13 : f32 to vector<8x1xf32>
    %29 = arith.addf %27, %28 : vector<8x1xf32>
    %30 = math.rsqrt %29 : vector<8x1xf32>
    %31 = vector.broadcast %30 : vector<8x1xf32> to vector<8x32xf32>
    %32 = arith.mulf %22, %31 : vector<8x32xf32>
    %c0_14 = arith.constant 0 : index
    %c0_15 = arith.constant 0 : index
    %33 = vector.load %arg8[%c0_14, %c0_15] : memref<1x32xf32, #tpu.memory_space<vmem>>, vector<1x32xf32>
    %34 = vector.broadcast %33 : vector<1x32xf32> to vector<8x32xf32>
    %35 = arith.mulf %32, %34 : vector<8x32xf32>
    %c0_16 = arith.constant 0 : index
    %c0_17 = arith.constant 0 : index
    %36 = vector.load %arg9[%c0_16, %c0_17] : memref<1x32xf32, #tpu.memory_space<vmem>>, vector<1x32xf32>
    %37 = vector.broadcast %36 : vector<1x32xf32> to vector<8x32xf32>
    %38 = arith.addf %35, %37 : vector<8x32xf32>
    %c0_18 = arith.constant 0 : index
    %c0_19 = arith.constant 0 : index
    %c0_20 = arith.constant 0 : index
    %39 = vector.load %arg10[%c0_18, %c0_19, %c0_20] : memref<1x8x32xf32, #tpu.memory_space<vmem>>, vector<1x8x32xf32>
    %40 = vector.shape_cast %39 : vector<1x8x32xf32> to vector<8x32xf32>
    %41 = vector.shape_cast %38 : vector<8x32xf32> to vector<1x8x32xf32>
    tpu.vector_store %arg10[%c0_18, %c0_19, %c0_20], %41 {strides = array<i32>} : memref<1x8x32xf32, #tpu.memory_space<vmem>>, vector<1x8x32xf32>,
    return
  }
  func.func @transform_0(%arg0: i32, %arg1: i32) -> (i32, i32, i32) {
    %c0_i32 = arith.constant 0 : i32
    %c0_i32_0 = arith.constant 0 : i32
    %c0_i32_1 = arith.constant 0 : i32
    return %arg0, %c0_i32, %c0_i32_0 : i32, i32, i32
  }
  func.func @transform_1(%arg0: i32, %arg1: i32) -> (i32, i32, i32) {
    %c0_i32 = arith.constant 0 : i32
    %c0_i32_0 = arith.constant 0 : i32
    %c0_i32_1 = arith.constant 0 : i32
    return %arg0, %c0_i32, %c0_i32_0 : i32, i32, i32
  }
  func.func @transform_2(%arg0: i32, %arg1: i32) -> (i32, i32) {
    %c0_i32 = arith.constant 0 : i32
    %c0_i32_0 = arith.constant 0 : i32
    %c0_i32_1 = arith.constant 0 : i32
    return %c0_i32, %c0_i32_0 : i32, i32
  }
  func.func @transform_3(%arg0: i32, %arg1: i32) -> (i32, i32) {
    %c0_i32 = arith.constant 0 : i32
    %c0_i32_0 = arith.constant 0 : i32
    %c0_i32_1 = arith.constant 0 : i32
    return %c0_i32, %c0_i32_0 : i32, i32
  }
  func.func @transform_4(%arg0: i32, %arg1: i32) -> (i32, i32, i32) {
    %c0_i32 = arith.constant 0 : i32
    %c0_i32_0 = arith.constant 0 : i32
    %c0_i32_1 = arith.constant 0 : i32
    %c0_i32_2 = arith.constant 0 : i32
    return %c0_i32, %c0_i32_0, %c0_i32_1 : i32, i32, i32
  }
  func.func @transform_5(%arg0: i32, %arg1: i32) -> (i32, i32) {
    %c0_i32 = arith.constant 0 : i32
    %c0_i32_0 = arith.constant 0 : i32
    %c0_i32_1 = arith.constant 0 : i32
    return %c0_i32, %c0_i32_0 : i32, i32
  }
  func.func @transform_6(%arg0: i32, %arg1: i32) -> (i32, i32) {
    %c0_i32 = arith.constant 0 : i32
    %c0_i32_0 = arith.constant 0 : i32
    %c0_i32_1 = arith.constant 0 : i32
    return %c0_i32, %c0_i32_0 : i32, i32
  }
  func.func @transform_7(%arg0: i32, %arg1: i32) -> (i32, i32) {
    %c0_i32 = arith.constant 0 : i32
    %c0_i32_0 = arith.constant 0 : i32
    %c0_i32_1 = arith.constant 0 : i32
    return %c0_i32, %c0_i32_0 : i32, i32
  }
  func.func @transform_8(%arg0: i32, %arg1: i32) -> (i32, i32, i32) {
    %c0_i32 = arith.constant 0 : i32
    %c0_i32_0 = arith.constant 0 : i32
    return %arg0, %arg1, %c0_i32 : i32, i32, i32
  }
}

</mosaic_0001>

<bundles_post_ra>
// kernel: tpu_custom_call.1
= control target key start
LH: loop header
LB: loop body
LE: loop exit
PB: predicated region body
PF: predicated region fallthrough
CT: control target
= control target key end

     0   :  { %s1662_s0 = inlined_call_operand.hbm [shape: f32[2,8,32], index: 0, kind: input, shape index: {}]   ;;  %s1663_s1 = inlined_call_operand.vmem [shape: f32[2,1,8], index: 1, kind: input, shape index: {}]   ;;  %s1664_s2 = inlined_call_operand.hbm [shape: bf16[32,96], index: 2, kind: input, shape index: {}]   ;;  %s1665_s3 = inlined_call_operand.vmem [shape: f32[1,96], index: 3, kind: input, shape index: {}]   ;;  %s1666_s4 = inlined_call_operand.hbm [shape: bf16[4,8,32], index: 4, kind: input, shape index: {}]   ;;  %s1667_s5 = inlined_call_operand.vmem [shape: f32[1,32], index: 5, kind: input, shape index: {}]   ;;  %s1668_s6 = inlined_call_operand.vmem [shape: f32[1,32], index: 6, kind: input, shape index: {}]   ;;  %s1669_s7 = inlined_call_operand.vmem [shape: f32[1,32], index: 7, kind: input, shape index: {}]   ;;  %s1670_s8 = inlined_call_operand.hbm [shape: f32[2,8,32], index: 8, kind: output, shape index: {}]  }
   0x1   :  { %1678 = sst [smem:[#allocation17_spill]] %s1670_s8 }
   0x2   :  { %13 = vsyncpa [#allocation6], 0 }
   0x3   :  { %15 = vsyncpa [#allocation6 + $0x1], 0 }
   0x4   :  { %16 = vsyncpa [#allocation9], 0 }
   0x5   :  { %17 = vsyncpa [#allocation7], 0 }
   0x6   :  { %19 = vsyncpa [#allocation7 + $0x1], 0  ;;  %s1335_s27 = smov 0   ;;  %s1337_s28 = smov 0  }
   0x7   :  { %s1339_s29 = smov 0   ;;  %s1341_s30 = smov 0  }
   0x8   :  { %s1343_s9 = smov 0   ;;  %s1345_s10 = smov 0  }
   0x9 LB: > { %1679 = sst [smem:[#allocation15_spill]] %s1239_s27  ;;  %s884_s11 = sadd.s32 4294967295, %s1259_s10   ;;  %s1259_s10 = sphi %s1345_s10, %s25_s10   ;;  %s1255_s9 = sphi %s1343_s9, %s1702_s9   ;;  %s1251_s30 = sphi %s1341_s30, %s1701_s30   ;;  %s1247_s29 = sphi %s1339_s29, %s1700_s29   ;;  %s1243_s28 = sphi %s1337_s28, %s1699_s28   ;;  %s1239_s27 = sphi %s1335_s27, %s1698_s27  }
   0xa   : > { %s885_s12 = sadd.s32 4294967294, %s1259_s10   ;;  %p57_p0 = scmp.ne.s32.totalorder %s1243_s28, %s1239_s27 }
   0xb   : > { %p1369_p1 = scmp.eq.s32.totalorder %s884_s11, 0  ;;  %p1373_p2 = scmp.eq.s32.totalorder %s884_s11, 1 }
   0xc   : > { %p241_p3 = scmp.eq.s32.totalorder %s885_s12, 1  ;;  %p886_p5 = scmp.ge.s32.totalorder %s1259_s10, 1 }
   0xd   : > { %s1680_s13 = scalar_select %p1369_p1, 1, 0 }
   0xe   : > { %p1379_p4 = por %p1369_p1, %p57_p0  ;;  %p1384_p6 = por %p241_p3, %p57_p0 }
   0xf   : > { %p248_p7 = scmp.lt.s32.totalorder %s1259_s10, 3  ;;  %s1269_s18 = smov [#allocation8]  }
  0x10   : > { %s1682_s15 = scalar_select %p1379_p4, 1, 0 }
  0x11   : > { %s1683_s16 = scalar_select %p1384_p6, 1, 0 }
  0x12   : > { %p1389_p8 = pnand %p886_p5, %p248_p7  ;;  %s260_s19 = sshll.u32 %s1269_s18, 4  ;;  %s1393_s19 = int_to_ptr.vmem [resolvable:$true] %s260_s19 }
  0x13   : > { %1684 = sst [smem:[#allocation16_spill]] %s1683_s16  ;;  %s1270_s21 = smov [#allocation10]  }
  0x14   : > { %p967_p9 = pneg %p1389_p8  ;;  %s276_s22 = sshll.u32 %s1270_s21, 4  ;;  %s1404_s22 = int_to_ptr.vmem [resolvable:$true] %s276_s22 }
  0x15   : > { %s1079_s25 = scalar_lea.hbm %s1664_s2, 256 }
  0x16   : > { %p1400_p11 = pnand %p967_p9, %p1369_p1  ;;  %p1080_p12 = scmp.ne.s32.totalorder %s1664_s2, %s1079_s25 }
  0x17   : > { %p1086_p5 = scmp.lt.u32.totalorder %s1079_s25, %s1664_s2 }
  0x18   : > { %p1081_p13 = pneg %p1400_p11 }
  0x1a   : > { %p1082_p0 = pnand %p1081_p13, %p1080_p12 }
  0x1c   : > { %p1083_p3 = pneg %p1082_p0 }
  0x1e   : > { %p1088_p7 = pnand %p1086_p5, %p1083_p3 }
  0x20   : > { %1091 = shalt.err (!%p1088_p7)
}
  0x21   : > { %s1092_s21 = scalar_lea.vmem %s1393_s19, 256  ;;  %p1100_p1 = scmp.lt.s32.totalorder %s1393_s19, %s1393_s19 }
  0x22   : > { %p1093_p9 = scmp.ne.s32.totalorder %s1393_s19, %s1092_s21  ;;  %p1101_p12 = scmp.lt.s32.totalorder %s1092_s21, %s1092_s21 }
  0x24   : > { %p1095_p10 = pnand %p1093_p9, %p1081_p13  ;;  %p1102_p0 = por %p1101_p12, %p1100_p1 }
  0x26   : > { %p1096_p6 = pneg %p1095_p10 }
  0x28   : > { %p1103_p4 = pnand %p1102_p0, %p1096_p6 }
  0x2a   : > { %1106 = shalt.err (!%p1103_p4)
}
  0x2b   : > { %s1271_s23 = smov 64   ;;  %s1272_s24 = smov 4  }
  0x2c   : > { %970 = dma.hbm_to_vmem [thread:$0]  (!%p1400_p11), %s1664_s2, 256, %s1393_s19, [#allocation9], %s1271_s23, %s1271_s23, %s1272_s24  }
  0x2d   : > { %s1107_s18 = scalar_lea.hbm %s1666_s4, 256 }
  0x2e   : > { %p1108_p1 = scmp.ne.s32.totalorder %s1666_s4, %s1107_s18  ;;  %p1114_p10 = scmp.lt.u32.totalorder %s1107_s18, %s1666_s4 }
  0x30   : > { %p1110_p4 = pnand %p1108_p1, %p1081_p13 }
  0x32   : > { %p1111_p6 = pneg %p1110_p4 }
  0x34   : > { %p1116_p3 = pnand %p1114_p10, %p1111_p6 }
  0x36   : > { %1119 = shalt.err (!%p1116_p3)
}
  0x37   : > { %s1120_s19 = scalar_lea.vmem %s1404_s22, 256  ;;  %p1128_p12 = scmp.lt.s32.totalorder %s1404_s22, %s1404_s22 }
  0x38   : > { %p1121_p5 = scmp.ne.s32.totalorder %s1404_s22, %s1120_s19  ;;  %p1129_p0 = scmp.lt.s32.totalorder %s1120_s19, %s1120_s19 }
  0x3a   : > { %p1123_p7 = pnand %p1121_p5, %p1081_p13  ;;  %p1130_p1 = por %p1129_p0, %p1128_p12 }
  0x3c   : > { %p1124_p9 = pneg %p1123_p7 }
  0x3e   : > { %p1131_p4 = pnand %p1130_p1, %p1124_p9 }
  0x40   : > { %1134 = shalt.err (!%p1131_p4)
}
  0x41   : > { %973 = dma.hbm_to_vmem [thread:$0]  (!%p1400_p11), %s1666_s4, 256, %s1404_s22, [#allocation9], %s1271_s23, %s1271_s23, %s1272_s24  }
  0x42   : > { %s37_s16 = sadd.s32 1, %s1255_s9  ;;  %s44_s25 = sadd.s32 1, %s1247_s29 }
  0x43   : > { %p39_p13 = scmp.ge.s32.totalorder %s37_s16, 2  ;;  %p51_p6 = scmp.ne.s32.totalorder %s1247_s29, %s1243_s28 }
  0x44   : > { %p52_p10 = scmp.eq.s32.totalorder %s1259_s10, 0  ;;  %p984_p3 = scmp.lt.s32.totalorder %s1259_s10, 2 }
  0x45   : > { %s1704_s16 = smov (%p39_p13, %s37_s16), 0  ;;  %p1468_p7 = por %p1373_p2, %p51_p6 }
  0x46   : > { %p53_p5 = por %p52_p10, %p51_p6  ;;  %s41_s26 = ssub.s32 %s1255_s9, %s1704_s16 }
  0x47   : > { %s1687_s20 = scalar_select %p1468_p7, 1, 0 }
  0x48   : > { %s299_s11 = sand.u32 1, %s1247_s29   ;;  %p42_p9 = scmp.eq.s32.totalorder %s41_s26, 0 }
  0x49   : > { %s890_s22 = sshll.u32 %s299_s11, 3  ;;  %s891_s23 = sshll.u32 %s1255_s9, 7 }
  0x4a   : > { %s1477_s24 = scalar_select %p42_p9, %s1247_s29, %s44_s25  }
  0x4b   : > { %s1482_s21 = scalar_lea.hbm %s1662_s0, %s891_s23  ;;  %s303_s14 = scalar_lea.vmem [#allocation5], %s890_s22 }
  0x4c   : > { %s310_s19 = sshll.u32 %s303_s14, 4  ;;  %p1486_p2 = pnand %p984_p3, %p53_p5  ;;  %s1490_s19 = int_to_ptr.vmem [resolvable:$true] %s310_s19 }
  0x4d   : > { %s300_s27 = scalar_lea.sflag [#allocation6], %s299_s11  ;;  %s1135_s25 = scalar_lea.hbm %s1482_s21, 128 }
  0x4e   : > { %p1136_p11 = scmp.ne.s32.totalorder %s1482_s21, %s1135_s25  ;;  %p1137_p12 = pneg %p1486_p2 }
  0x4f   : > { %s1140_s23 = scalar_lea.hbm %s1662_s0, 256  ;;  %p1141_p4 = scmp.lt.u32.totalorder %s1482_s21, %s1662_s0 }
  0x50   : > { %p1138_p0 = pnand %p1137_p12, %p1136_p11  ;;  %p1142_p13 = scmp.lt.u32.totalorder %s1140_s23, %s1135_s25 }
  0x51   : > { %p1144_p10 = scmp.lt.u32.totalorder %s1135_s25, %s1482_s21 }
  0x52   : > { %p1139_p1 = pneg %p1138_p0  ;;  %p1143_p6 = por %p1142_p13, %p1141_p4 }
  0x54   : > { %p1145_p3 = por %p1144_p10, %p1143_p6 }
  0x56   : > { %p1146_p5 = pnand %p1145_p3, %p1139_p1 }
  0x58   : > { %1149 = shalt.err (!%p1146_p5)
}
  0x59   : > { %s1150_s11 = scalar_lea.vmem %s1490_s19, 128  ;;  %s1273_s14 = smov [#allocation5]  }
  0x5a   : > { %p1151_p9 = scmp.ne.s32.totalorder %s1490_s19, %s1150_s11  ;;  %s1155_s26 = sshll.u32 %s1273_s14, 4  ;;  %s1156_s26 = int_to_ptr.vmem [resolvable:$false] %s1155_s26 }
  0x5b   : > { %s1157_s22 = scalar_lea.vmem %s1156_s26, 256  ;;  %p1158_p7 = scmp.lt.s32.totalorder %s1490_s19, %s1156_s26 }
  0x5c   : > { %p1153_p11 = pnand %p1151_p9, %p1137_p12  ;;  %p1159_p4 = scmp.lt.s32.totalorder %s1157_s22, %s1150_s11 }
  0x5e   : > { %p1154_p0 = pneg %p1153_p11  ;;  %p1160_p13 = por %p1159_p4, %p1158_p7 }
  0x60   : > { %p1161_p6 = pnand %p1160_p13, %p1154_p0 }
  0x62   : > { %1164 = shalt.err (!%p1161_p6)
}
  0x63   : > { %977 = dma.hbm_to_vmem [thread:$0]  (!%p1486_p2), %s1482_s21, 128, %s1490_s19, %s300_s27  }
  0x64   : > { %325 = sbr.rel (%p1389_p8) target bundleno = 1772 (0x6ec), region = 52  ;;  %s1520_s25 = sand.u32 (!%p1389_p8), 1, %s1243_s28  }
  0x65   : > { %s893_s23 = sshll.u32 (!%p1389_p8), %s1520_s25, 3  ;;  %s328_s12 = scalar_lea.sflag (!%p1389_p8), [#allocation6], %s1520_s25 }
  0x66   : > { %s1526_s18 = scalar_lea.vmem (!%p1389_p8), [#allocation5], %s893_s23  ;;  %p1689_p7 = scmp.ne.s32.totalorder (!%p1389_p8), %s1682_s15, 0 }
  0x6b   : > { %1226 = dma.done.wait (%p1689_p7), %s328_s12, 128  }
  0x6c   : > { %1228 = vsyncadd (%p1689_p7), %s328_s12, 4294967168  ;;  %p1690_p2 = scmp.ne.s32.totalorder %s1680_s13, 0 }
  0x6e   : > { %1230 = dma.done.wait (%p1690_p2), [#allocation9], 512  }
  0x6f   : > { %1232 = vsyncadd (%p1690_p2), [#allocation9], 4294966784  ;;  %p375_p8 = scmp.lt.s32.totalorder %s1251_s30, 1  ;;  %v1274_v0 = vmov 0.0   ;;  %vm1275_vm0 = vmmov 0   ;;  %v1071_v2 = vld [vmem:[#allocation8] sm:$0xff]  }
  0x70   : > { %929 = vmatprep.subr.bf16.mxu0 %v1274_v0  ;;  %933 = vmatprep.mubr.msk.bf16.mxu0 %vm1275_vm0, %v1274_v0  ;;  %v1072_v3 = vld [vmem:[#allocation8 + $0x8] sm:$0xff]   ;;  %v383_v4 = vld [vmem:[%s1526_s18] sm:$0xff]  ;;  %vm408_vm1 = vcmask 261120   ;;  %v897_v6 = vld [vmem:[%s1665_s3] ss:$0 sm:$0xff]  ;;  %vm454_vm2 = vcmask 60416  }
  0x71   : > { %s376_s17 = scalar_select %p375_p8, %s1251_s30, 1  ;;  %930 = vmatpush3.bf16.msra.mxu0 %v1071_v2  ;;  %v384_v5 = vpack.c.bf16 %v383_v4, %v383_v4  ;;  %v1564_v26 = vmov 0.0  }
  0x72   : > { %931 = vmatprep.subr.bf16.mxu0 %v1274_v0  ;;  %s1276_s27 = smov 88   ;;  %s1277_s11 = smov 96  }
  0x73   : > { %s377_s15 = scalar_lea.vmem %s1663_s1, %s376_s17  ;;  %s1278_s14 = smov 48  }
  0x74   : > { %v1541_v1 = vld [vmem:[%s377_s15] ss:$0 sm:$0xff]  ;;  %s1279_s26 = smov 64   ;;  %s1280_s22 = smov 56  }
  0x75   : > { %932 = vmatpush3.bf16.msra.mxu0 %v1072_v3  ;;  %s1281_s12 = smov 120   ;;  %s1282_s17 = smov 80  }
  0x76   : > { %s1283_s21 = smov 112   ;;  %s1284_s19 = smov 104  }
  0x77   : > { %s1285_s15 = smov 72   ;;  %s1286_s13 = smov 40  }
  0x78   : > { %934 = vmatmul.mubr.msk.bf16.vlgmr.msra.gmra.mrb[0].mxu0 %vm408_vm1, %v384_v5  ;;  %s1562_s8 = scalar_lea.vmem [#allocation11], %s893_s23 }
 0x14b   : > { %v446_v7 = vpop.f32.mrb[0].mxu0 }
 0x14c   : > { %v447_v8 = vadd.f32 %v897_v6, %v446_v7  ;;  %v935_v9 = vpop.f32.mrb[1].mxu0 }
 0x14d   : > { %v449_v10 = vpop.f32.mrb[2].mxu0 }
 0x14e   : > { %v452_v11 = vmul.f32 0.35355338, %v447_v8  ;;  %v918_v12 = vpack.c.bf16 %v447_v8, %v447_v8  ;;  %v936_v13 = vpop.f32.mrb[3].mxu0 }
 0x150   : > { %v453_v14 = vpack.c.bf16 %v452_v11, %v452_v11  ;;  %476 = vrot.lane.b32.xlu1 %v918_v12, %s1276_s27  ;;  %460 = vrot.lane.b32.xlu0 %v918_v12, %s1277_s11  ;;  %s1566_s27 = smov 0  }
 0x152   : > { %455 = vst.msk [vmem:[#allocation2] sm:$0xf] %vm454_vm2, %v453_v14 }
 0x154   : > { %496 = vrot.lane.b32.xlu1 %v918_v12, %s1278_s14  ;;  %464 = vrot.lane.b32.xlu0 %v918_v12, %s1279_s26 }
 0x158   : > { %481 = vrot.lane.b32.xlu0 %v918_v12, %s1280_s22  ;;  %471 = vrot.lane.b32.xlu1 %v453_v14, %s1281_s12 }
 0x15c   : > { %491 = vrot.lane.b32.xlu0 %v918_v12, %s1282_s17  ;;  %486 = vrot.lane.b32.xlu1 %v453_v14, %s1283_s21 }
 0x160   : > { %501 = vrot.lane.b32.xlu0 %v453_v14, %s1284_s19  ;;  %506 = vrot.lane.b32.xlu1 %v918_v12, %s1285_s15 }
 0x164   : > { %511 = vrot.lane.b32.xlu0 %v918_v12, %s1286_s13 }
 0x1c2   : > { %v477_v15 = vpop.permute.xlu1 %476  ;;  %v461_v16 = vpop.permute.xlu0 %460 }
 0x1c3   : > { %480 = vst.msk [vmem:[#allocation3 + $0x4] sm:$0xf] %vm454_vm2, %v477_v15  ;;  %463 = vst.msk [vmem:[#allocation3] sm:$0xf] %vm454_vm2, %v461_v16 }
 0x1c6   : > { %v497_v17 = vpop.permute.xlu1 %496  ;;  %v465_v18 = vpop.permute.xlu0 %464 }
 0x1c7   : > { %500 = vst.msk [vmem:[#allocation4 + $0x8] sm:$0xf] %vm454_vm2, %v497_v17  ;;  %467 = vst.msk [vmem:[#allocation4] sm:$0xf] %vm454_vm2, %v465_v18 }
 0x1ca   : > { %v482_v19 = vpop.permute.xlu0 %481  ;;  %v472_v20 = vpop.permute.xlu1 %471 }
 0x1cb   : > { %485 = vst.msk [vmem:[#allocation4 + $0x4] sm:$0xf] %vm454_vm2, %v482_v19  ;;  %475 = vst.msk [vmem:[#allocation2 + $0x4] sm:$0xf] %vm454_vm2, %v472_v20 }
 0x1ce   : > { %v492_v21 = vpop.permute.xlu0 %491  ;;  %v487_v22 = vpop.permute.xlu1 %486 }
 0x1cf   : > { %495 = vst.msk [vmem:[#allocation3 + $0x8] sm:$0xf] %vm454_vm2, %v492_v21  ;;  %490 = vst.msk [vmem:[#allocation2 + $0x8] sm:$0xf] %vm454_vm2, %v487_v22 }
 0x1d2   : > { %v502_v23 = vpop.permute.xlu0 %501  ;;  %v507_v24 = vpop.permute.xlu1 %506 }
 0x1d3   : > { %505 = vst.msk [vmem:[#allocation2 + $0xc] sm:$0xf] %vm454_vm2, %v502_v23  ;;  %510 = vst.msk [vmem:[#allocation3 + $0xc] sm:$0xf] %vm454_vm2, %v507_v24 }
 0x1d6   : > { %v512_v25 = vpop.permute.xlu0 %511 }
 0x1d7   : > { %515 = vst.msk [vmem:[#allocation4 + $0xc] sm:$0xf] %vm454_vm2, %v512_v25 }
 0x1d8 LB: >> { %v1287_v27 = vmov 0.0   ;;  %vm1288_vm3 = vmmov 0   ;;  %s1574_s11 = sshll.u32 %s1267_s27, 2  ;;  %vm543_vm4 = vcmask 64512   ;;  %vm605_vm5 = vcmask 1043456   ;;  %s523_s27 = sadd.s32 1, %s1267_s27   ;;  %s1267_s27 = sphi %s1566_s27, %s523_s27   ;;  %v1263_v26 = vphi %v1564_v26, %v1691_v26  }
 0x1d9   : >> { %937 = vmatprep.subr.bf16.mxu0 %v1287_v27  ;;  %939 = vmatprep.mubr.msk.bf16.mxu0 %vm1288_vm3, %v1287_v27  ;;  %s532_s23 = scalar_lea.vmem [#allocation3], %s1574_s11  ;;  %s529_s14 = scalar_lea.vmem [#allocation2], %s1574_s11 }
 0x1da   : >> { %943 = vmatprep.subr.bf16.mxu1 %v1287_v27  ;;  %945 = vmatprep.mubr.msk.bf16.mxu1 %vm1288_vm3, %v1287_v27  ;;  %v533_v28 = vld [vmem:[%s532_s23] sm:$0xf]  ;;  %s535_s26 = scalar_lea.vmem [#allocation4], %s1574_s11  ;;  %s651_s22 = scalar_lea.vmem [#allocation10], %s1574_s11 }
 0x1db   : >> { %v548_v29 = vsel %vm543_vm4, %v533_v28, 0  ;;  %v530_v30 = vld [vmem:[%s529_s14] sm:$0xf]  ;;  %p520_p12 = scmp.ge.s32.totalorder %s523_s27, 4  }
 0x1dc   : >> { %938 = vmatpush3.bf16.xpose.msra.mxu0 %v548_v29  ;;  %v652_v46 = vld [vmem:[%s651_s22] sm:$0xf]  ;;  %v709_v61 = vld [vmem:[%s1526_s18] sm:$0xff] (%p520_p12)  ;;  %s915_s13 = sshll.u32 (%p520_p12), %s1251_s30, 7  ;;  %s758_s27 = sshll.u32 (%p520_p12), %s1562_s8, 4  ;;  %s1613_s27 = int_to_ptr.vmem [resolvable:$true] %s758_s27 }
 0x1dd   : >> { %v657_v48 = vsel %vm605_vm5, %v652_v46, 0  ;;  %v911_v60 = vld [vmem:[%s1667_s5] ss:$0 sm:$0xff] (%p520_p12)  ;;  %s1692_s14 = sld [smem:[#allocation17_spill]] (%p520_p12)  ;;  %s744_s22 = scalar_lea.sflag (%p520_p12), [#allocation7], %s1520_s25 }
 0x1de   : >> { %v536_v42 = vld [vmem:[%s535_s26] sm:$0xf]  ;;  %s1165_s12 = scalar_lea.vmem (%p520_p12), %s1613_s27, 128  ;;  %p1693_p10 = scmp.ne.s32.totalorder (%p520_p12), %s1687_s20, 0 }
 0x1df   : >> { %v607_v43 = vsel %vm605_vm5, %v536_v42, 0  ;;  %v912_v10 = vld [vmem:[%s1668_s6] ss:$0 sm:$0xff] (%p520_p12)  ;;  %p1166_p1 = scmp.ne.s32.totalorder (%p520_p12), %s1613_s27, %s1165_s12  ;;  %s1289_s30 = smov (%p520_p12), [#allocation11]  }
 0x1e0   : >> { %944 = vmatpush3.bf16.msra.mxu1 %v607_v43  ;;  %v913_v12 = vld [vmem:[%s1669_s7] ss:$0 sm:$0xff] (%p520_p12)  ;;  %s1169_s17 = sshll.u32 (%p520_p12), %s1289_s30, 4  ;;  %s1170_s17 = int_to_ptr.vmem [resolvable:$false] %s1169_s17 }
 0x1e1   : >> { %949 = vmatprep.subr.bf16.mxu1 %v1287_v27  ;;  %p1167_p3 = pnand (%p520_p12), %p1166_p1, %p1693_p10  ;;  %s1171_s18 = scalar_lea.vmem (%p520_p12), %s1170_s17, 256 }
 0x1e2   : > { %p1172_p9 = scmp.lt.s32.totalorder (%p520_p12), %s1613_s27, %s1170_s17  ;;  %p1173_p11 = scmp.lt.s32.totalorder (%p520_p12), %s1171_s18, %s1165_s12 }
 0x1e3   : >> { %940 = vmatmul.mubr.msk.bf16.vlgmr.msra.gmra.mrb[0].mxu0 %vm543_vm4, %v530_v30  ;;  %s1611_s26 = scalar_lea.hbm (%p520_p12), %s1692_s14, %s915_s13  ;;  %p1168_p5 = pneg (%p520_p12), %p1167_p3 }
 0x1e4   : > { %p1174_p0 = por (%p520_p12), %p1173_p11, %p1172_p9 }
 0x1e6   : > { %p1175_p4 = pnand (%p520_p12), %p1174_p0, %p1168_p5 }
 0x2b6   : >> { %v584_v31 = vpop.f32.mrb[0].mxu0 }
 0x2b7   : >> { %v585_v32 = vadd.f32 %v1541_v1, %v584_v31  ;;  %v941_v33 = vpop.f32.mrb[1].mxu0 }
 0x2b8   : >> { %v587_v34 = vpop.f32.mrb[2].mxu0 }
 0x2b9   : >> { %v942_v35 = vpop.f32.mrb[3].mxu0  ;;  %v590_v36 = vsel %vm543_vm4, %v585_v32, -inf }
 0x2ba   : >> { %591 = vmax.xlane.f32.xlu0 %v590_v36 }
 0x347   : >> { %v592_v37 = vpop.xlane.xlu0 %591 }
 0x348   : >> { %v593_v38 = vsub.f32 %v585_v32, %v592_v37 }
 0x34a   : >> { %v594_v39 = vmul.f32 1.442695, %v593_v38 }
 0x34c   : >> { %1073 = vpow2.f32 %v594_v39 }
 0x356   : >> { %v1074_v40 = vpop.eup %1073 }
 0x357   : >> { %v596_v41 = vsel %vm543_vm4, %v1074_v40, 0.0 }
 0x358   : >> { %597 = vadd.xlane.f32.xlu0 %v596_v41 }
 0x3e5   : >> { %v598_v44 = vpop.xlane.xlu0 %597 }
 0x3e6   : >> { %1075 = vrcp.f32 %v598_v44 }
 0x3f0   : >> { %v1076_v45 = vpop.eup %1075 }
 0x3f1   : >> { %v600_v47 = vmul.f32 %v1076_v45, %v1074_v40 }
 0x3f3   : >> { %v601_v49 = vpack.c.bf16 %v600_v47, %v600_v47 }
 0x3f5   : >> { %946 = vmatmul.mubr.msk.bf16.vlgmr.msra.gmra.mrb[0].mxu1 %vm543_vm4, %v601_v49 }
 0x3f6   : >> { %950 = vmatpush3.bf16.msra.mxu1 %v657_v48  ;;  %951 = vmatprep.mubr.msk.bf16.mxu1 %vm1288_vm3, %v1287_v27 }
 0x4c8   : >> { %v643_v50 = vpop.f32.mrb[0].mxu1 }
 0x4c9   : >> { %v649_v51 = vpack.c.bf16 %v643_v50, %v643_v50  ;;  %v947_v52 = vpop.f32.mrb[1].mxu1 }
 0x4ca   : >> { %v646_v53 = vpop.f32.mrb[2].mxu1 }
 0x4cb   : >> { %v948_v54 = vpop.f32.mrb[3].mxu1  ;;  %952 = vmatmul.mubr.msk.bf16.vlgmr.msra.gmra.mrb[4].mxu1 %vm543_vm4, %v649_v51 }
 0x59b   : > { %522 = sbr.rel (!%p520_p12) target bundleno = 472 (0x1d8), region = 133 }
 0x59e   : >> { %v693_v55 = vpop.f32.mrb[4].mxu1 }
 0x59f   : >> { %v699_v56 = vadd.f32 %v1263_v26, %v693_v55   ;;  %v953_v57 = vpop.f32.mrb[5].mxu1 }
 0x5a0   : >> { %v696_v58 = vpop.f32.mrb[6].mxu1 }
 0x5a1   : >> { %v954_v59 = vpop.f32.mrb[7].mxu1  ;;  %v1691_v26 = vmov %v699_v56  ;;  %v707_v62 = vadd.f32 (%p520_p12), %v911_v60, %v699_v56 }
 0x5a3   : > { %v710_v63 = vadd.f32 %v709_v61, %v707_v62 }
 0x5a5   : > { %v712_v0 = vsel %vm408_vm1, %v710_v63, 0.0 }
 0x5a6   : > { %713 = vadd.xlane.f32.xlu0 %v712_v0 }
 0x633   : > { %v714_v2 = vpop.xlane.xlu0 %713 }
 0x634   : > { %v716_v3 = vmul.f32 0.03125, %v714_v2 }
 0x636   : > { %v717_v4 = vsub.f32 %v710_v63, %v716_v3 }
 0x638   : > { %v718_v5 = vmul.f32 %v717_v4, %v717_v4 }
 0x63a   : > { %v719_v6 = vsel %vm408_vm1, %v718_v5, 0.0 }
 0x63b   : > { %720 = vadd.xlane.f32.xlu0 %v719_v6 }
 0x6c8   : > { %v721_v1 = vpop.xlane.xlu0 %720 }
 0x6c9   : > { %v722_v7 = vmul.f32 0.03125, %v721_v1 }
 0x6cb   : > { %v723_v8 = vadd.f32 1e-12, %v722_v7 }
 0x6cd   : > { %1077 = vrsqrt.f32 %v723_v8 }
 0x6d7   : > { %v1078_v9 = vpop.eup %1077 }
 0x6d8   : > { %v725_v11 = vmul.f32 %v1078_v9, %v717_v4 }
 0x6da   : > { %v733_v13 = vmul.f32 %v912_v10, %v725_v11 }
 0x6dc   : > { %v741_v14 = vadd.f32 %v913_v12, %v733_v13 }
 0x6de   : > { %742 = vst.msk [vmem:[%s1562_s8] sm:$0xff] %vm408_vm1, %v741_v14 }
 0x6df   : > { %1178 = shalt.err (!%p1175_p4)
}
 0x6e0   : > { %s1179_s25 = scalar_lea.hbm %s1611_s26, 128  ;;  %s1183_s19 = scalar_lea.hbm %s1692_s14, 256 }
 0x6e1   : > { %p1180_p13 = scmp.ne.s32.totalorder %s1611_s26, %s1179_s25  ;;  %p1184_p2 = scmp.lt.u32.totalorder %s1611_s26, %s1692_s14 }
 0x6e2   : > { %p1185_p8 = scmp.lt.u32.totalorder %s1183_s19, %s1179_s25  ;;  %p1187_p1 = scmp.lt.u32.totalorder %s1179_s25, %s1611_s26 }
 0x6e3   : > { %p1181_p6 = pnand %p1180_p13, %p1693_p10 }
 0x6e4   : > { %p1186_p12 = por %p1185_p8, %p1184_p2 }
 0x6e5   : > { %p1182_p7 = pneg %p1181_p6 }
 0x6e6   : > { %p1188_p3 = por %p1187_p1, %p1186_p12 }
 0x6e8   : > { %p1189_p5 = pnand %p1188_p3, %p1182_p7 }
 0x6ea   : > { %1192 = shalt.err (!%p1189_p5)
}
 0x6eb   : > { %965 = dma.vmem_to_hbm [thread:$0]  (%p1693_p10), %s1613_s27, 128, %s1611_s26, %s744_s22  }
 0x6ec PF: > { %s1694_s11 = sld [smem:[#allocation15_spill]]  ;;  %s1695_s23 = sld [smem:[#allocation16_spill]] }
 0x6ed   : > { %p1697_p11 = scmp.ge.s32.totalorder %s1259_s10, 2 }
 0x6f2   : > { %s770_s12 = sand.u32 1, %s1694_s11   ;;  %p1696_p9 = scmp.ne.s32.totalorder %s1695_s23, 0 }
 0x6f3   : > { %s771_s30 = scalar_lea.sflag [#allocation7], %s770_s12 }
 0x6f4   : > { %p979_p0 = pnand %p1697_p11, %p1696_p9 }
 0x6f6   : > { %1234 = dma.done.wait (!%p979_p0), %s771_s30, 128  }
 0x6f7   : > { %1236 = vsyncadd (!%p979_p0), %s771_s30, 4294967168  ;;  %s25_s10 = sadd.s32 1, %s1259_s10   ;;  %s1698_s27 = smov %s1243_s28 }
 0x6f8   : > { %p22_p4 = scmp.ge.s32.totalorder %s25_s10, 4   ;;  %s1699_s28 = smov %s1247_s29 }
 0x6f9   : > { %s1700_s29 = smov %s1477_s24  ;;  %s1701_s30 = smov %s1255_s9 }
 0x6fa   : > { %s1702_s9 = smov %s1704_s16  ;;  %24 = sbr.rel (!%p22_p4) target bundleno = 9 (0x9), region = 144 }
 0x701   :  { %776 = vsyncpa [#allocation6], 1 }
 0x702   :  { %778 = vsyncpa [#allocation6 + $0x1], 1 }
 0x703   :  { %779 = vsyncpa [#allocation9], 1 }
 0x704   :  { %780 = vsyncpa [#allocation7], 1 }
 0x705   :  { %782 = vsyncpa [#allocation7 + $0x1], 1 }

</bundles_post_ra>
